<compile_context>
chip_gen: v6e
topology: v6e:2x2x1
jax: 0.10.0
libtpu: 0.0.40
codegen_flags: <defaults>
</compile_context>

<pallas_src>
import functools

import jax
import jax.numpy as jnp
from jax.experimental import pallas as pl
from jax.experimental.pallas import tpu as pltpu


# --------------------------------------------------------------------------
# Kernel bodies
# --------------------------------------------------------------------------
def _compute(x, w, bias_val, o_ref, *, eps, feature_dim, split_store, approx):
    # x: (TL, D), w: (D, F)  ->  z: (TL, F) in f32 (MXU accumulates in f32,
    # bf16 inputs are consumed natively).
    z = jnp.dot(x, w, preferred_element_type=jnp.float32)
    if bias_val is not None:          # only when an explicit bias is passed
        z = z + bias_val

    if split_store:
        # F is a multiple of 128: two unmasked lane-dense stores, no concat.
        m_pos = jnp.max(z, axis=-1, keepdims=True)
        e_pos = jnp.exp(z - m_pos)
        inv_p = pl.reciprocal(jnp.sum(e_pos, axis=-1, keepdims=True), approx=approx)
        pos = jnp.maximum(e_pos * inv_p, eps)

        # softmax(-z) == exp(min(z) - z) / sum(.)   (no negate of z needed)
        m_neg = jnp.min(z, axis=-1, keepdims=True)
        e_neg = jnp.exp(m_neg - z)
        inv_n = pl.reciprocal(jnp.sum(e_neg, axis=-1, keepdims=True), approx=approx)
        neg = jnp.maximum(e_neg * inv_n, eps)

        o_ref[0, 0, :, :feature_dim] = pos.astype(o_ref.dtype)
        o_ref[0, 0, :, feature_dim:] = neg.astype(o_ref.dtype)
    else:
        # F < 128 (e.g. 64 -> 2F = 128): pack both exponent arguments into one
        # (TL, 2F) buffer so the single jnp.exp runs at full 128-lane width,
        # then one unmasked 2F-lane store.  All packed values are <= 0, so
        # exp is in (0, 1] and the row sums are >= 1 (no overflow / div-by-0).
        m_pos = jnp.max(z, axis=-1, keepdims=True)
        m_neg = jnp.min(z, axis=-1, keepdims=True)
        packed = jnp.concatenate([z - m_pos, m_neg - z], axis=-1)   # (TL, 2F)
        e = jnp.exp(packed)
        lane = jax.lax.broadcasted_iota(jnp.int32, e.shape, e.ndim - 1)
        is_pos = lane < feature_dim
        s_pos = jnp.sum(jnp.where(is_pos, e, 0.0), axis=-1, keepdims=True)
        s_neg = jnp.sum(jnp.where(is_pos, 0.0, e), axis=-1, keepdims=True)
        inv = jnp.where(is_pos,
                        pl.reciprocal(s_pos, approx=approx),
                        pl.reciprocal(s_neg, approx=approx))
        o_ref[0, 0] = jnp.maximum(e * inv, eps).astype(o_ref.dtype)


def _kernel_nobias(x_ref, w_ref, o_ref, **kw):
    # x_ref: (1,1,TL,D), w_ref: (1,D,F), o_ref: (1,1,TL,2F)
    _compute(x_ref[0, 0], w_ref[0], None, o_ref, **kw)


def _kernel_bias(bias_ref, x_ref, w_ref, o_ref, **kw):
    # bias_ref: (H,) per-head scalar in SMEM (scalar prefetch); h = grid axis 0.
    _compute(x_ref[0, 0], w_ref[0], bias_ref[pl.program_id(0)], o_ref, **kw)


# --------------------------------------------------------------------------
# Tile / VMEM heuristics (generation-aware)
# --------------------------------------------------------------------------
def _vmem_capacity_bytes():
    try:
        cap = getattr(pltpu.get_tpu_info(), "vmem_capacity_bytes", None)
        if cap:
            return int(cap)
    except Exception:
        pass
    return 64 << 20   # conservative fallback = v7x per-TensorCore VMEM


def _step_vmem_bytes(tl, D, F, in_bytes, out_bytes):
    # double-buffered x tile + double-buffered out tile + double-buffered
    # weight + f32 intermediates (z, exp buffers, packed/concat, scaled out).
    return (2 * tl * D * in_bytes
            + 2 * tl * 2 * F * out_bytes
            + 2 * D * F * in_bytes
            + 6 * tl * F * 4)


def _pick_seq_tile(L, D, F, in_bytes, out_bytes, sub, *, target, budget):
    """Largest seq tile <= target that fits the VMEM budget; multiple of `sub`
    rows.  Prefers an exact divisor of L; otherwise the last grid tile is
    ragged (Pallas masks the out-of-range rows)."""
    cap = target
    while cap > sub and _step_vmem_bytes(cap, D, F, in_bytes, out_bytes) > budget:
        cap //= 2
    cap = max(sub, (cap // sub) * sub)
    if L <= cap:
        return L
    t = cap
    while t >= sub:                 # prefer a divisor (no ragged last tile)
        if L % t == 0:
            return t
        t -= sub
    return cap                      # ragged last tile


# --------------------------------------------------------------------------
# Public wrapper
# --------------------------------------------------------------------------
def hedgehog_feature_map(x: jax.Array, layer: jax.Array, bias=None, *,
                         eps: float = 1e-12, seq_tile: int | None = None,
                         out_dtype=None, approx_reciprocal: bool = True
                         ) -> jax.Array:
    """x: (B,H,L,D), layer: (H,D,F), bias: None or (1,H,1,1)/(H,) -> (B,H,L,2F).

    For best HBM throughput pass bf16 x / layer and out_dtype=jnp.bfloat16
    (cuts total HBM traffic ~2x; MXU consumes bf16 natively with f32 acc).
    approx_reciprocal=False gives exactly-normalized softmax rows at a small
    EUP->divide cost."""
    B, H, L, D = x.shape
    Hw, Dw, F = layer.shape
    assert (H, D) == (Hw, Dw), (x.shape, layer.shape)
    out_dtype = x.dtype if out_dtype is None else jnp.dtype(out_dtype)

    in_bytes = jnp.dtype(x.dtype).itemsize
    out_bytes = jnp.dtype(out_dtype).itemsize
    # sublane packing: f32 -> 8-row tiles, bf16 -> 16, int8/fp8 -> 32.
    sub = max(32 // in_bytes, 32 // out_bytes)

    vmem_cap = _vmem_capacity_bytes()
    # ~48 MiB tile budget on 128 MiB parts (v5e/v6e), ~24 MiB on 64 MiB v7x.
    budget = min(48 << 20, (vmem_cap * 3) // 8)
    target = 1024 if vmem_cap >= (96 << 20) else 512

    if seq_tile is None:
        tl = _pick_seq_tile(L, D, F, in_bytes, out_bytes, sub,
                            target=target, budget=budget)
        # v7x has 2 TensorCores/chip: keep >= 2 grid steps when B*H == 1.
        if B * H == 1 and tl >= L and L >= 2 * sub:
            tl = max(sub, ((L // 2) // sub) * sub)
    else:
        tl = seq_tile
    assert tl == L or tl % sub == 0, (tl, sub)   # (8,128)-style BlockSpec rule

    split_store = (F % 128 == 0)
    kw = dict(eps=eps, feature_dim=F, split_store=split_store,
              approx=approx_reciprocal)

    footprint = _step_vmem_bytes(tl, D, F, in_bytes, out_bytes)
    # Raise the scoped VMEM limit (v5e default is 16 MiB) but stay well under
    # the physical capacity of this generation (64 MiB on v7x).
    vmem_limit = int(min(max(32 << 20, footprint + (8 << 20)),
                         (vmem_cap * 4) // 5))

    grid = (H, B, pl.cdiv(L, tl))
    x_block = (1, 1, tl, D)
    w_block = (1, D, F)
    o_block = (1, 1, tl, 2 * F)
    out_shape = jax.ShapeDtypeStruct((B, H, L, 2 * F), out_dtype)
    cparams = pltpu.CompilerParams(
        dimension_semantics=("parallel", "parallel", "parallel"),
        vmem_limit_bytes=vmem_limit)

    if bias is None:
        # Module default: no bias, no scalar-prefetch plumbing, no (TL,F) add.
        grid_spec = pltpu.PrefetchScalarGridSpec(
            num_scalar_prefetch=0, grid=grid,
            in_specs=[
                pl.BlockSpec(x_block, lambda h, b, l: (b, h, l, 0)),
                # Head-major grid: weight block index constant across (b, l)
                # -> DMA'd only H times total, VMEM-resident otherwise.
                pl.BlockSpec(w_block, lambda h, b, l: (h, 0, 0)),
            ],
            out_specs=pl.BlockSpec(o_block, lambda h, b, l: (b, h, l, 0)))
        return pl.pallas_call(
            functools.partial(_kernel_nobias, **kw),
            out_shape=out_shape, grid_spec=grid_spec,
            compiler_params=cparams,
        )(x, layer)

    # Per-head scalar bias -> flat (H,) vector in SMEM via scalar prefetch.
    bias_vec = jnp.asarray(bias, jnp.float32).reshape(-1)
    assert bias_vec.shape == (H,), bias_vec.shape
    grid_spec = pltpu.PrefetchScalarGridSpec(
        num_scalar_prefetch=1, grid=grid,
        in_specs=[
            pl.BlockSpec(x_block, lambda h, b, l, bias: (b, h, l, 0)),
            pl.BlockSpec(w_block, lambda h, b, l, bias: (h, 0, 0)),
        ],
        out_specs=pl.BlockSpec(o_block, lambda h, b, l, bias: (b, h, l, 0)))
    return pl.pallas_call(
        functools.partial(_kernel_bias, **kw),
        out_shape=out_shape, grid_spec=grid_spec,
        compiler_params=cparams,
    )(bias_vec, x, layer)


# --------------------------------------------------------------------------
# Pure-JAX reference (mirrors the PyTorch module)
# --------------------------------------------------------------------------
def _reference(x, layer, bias=0.0, eps=1e-12):
    z = jnp.einsum('hdf,bhld->bhlf', layer, x) + bias
    out = jnp.concatenate(
        [jax.nn.softmax(z, axis=-1), jax.nn.softmax(-z, axis=-1)], axis=-1)
    return jnp.maximum(out, eps)


if __name__ == "__main__":
    # Small shapes consistent with the module's forward:
    #   x = (batch_size, num_heads, seq_len, head_dim)
    B, H, L, D, F = 2, 4, 16, 32, 64
    eps = 1e-12

    key = jax.random.PRNGKey(0)
    kx, kw, kb = jax.random.split(key, 3)

    # Deterministic kaiming-uniform-style init for layer (H, D, F).
    bound = (6.0 / (D * F)) ** 0.5
    layer = jax.random.uniform(kw, (H, D, F), jnp.float32, -bound, bound)
    x = jax.random.normal(kx, (B, H, L, D), jnp.float32)
    bias = jax.random.uniform(kb, (1, H, 1, 1), jnp.float32, -1.0, 1.0)

    tol = 2e-3   # approx EUP reciprocal -> slightly loosened tolerance

    # 1) bias=False path (module default), F=64 -> packed full-lane-width path.
    out = jax.block_until_ready(hedgehog_feature_map(x, layer, eps=eps))
    ref = _reference(x, layer, 0.0, eps=eps)
    assert out.shape == (B, H, L, 2 * F), out.shape
    assert jnp.allclose(out, ref, atol=tol, rtol=tol), \
        float(jnp.max(jnp.abs(out - ref)))

    # 2) bias=True path (per-head scalar bias via SMEM scalar prefetch).
    out_b = jax.block_until_ready(hedgehog_feature_map(x, layer, bias, eps=eps))
    ref_b = _reference(x, layer, bias, eps=eps)
    assert jnp.allclose(out_b, ref_b, atol=tol, rtol=tol), \
        float(jnp.max(jnp.abs(out_b - ref_b)))

    # 3) bf16 I/O path (the HBM-traffic optimization): bf16 in, bf16 out.
    out_bf = jax.block_until_ready(hedgehog_feature_map(
        x.astype(jnp.bfloat16), layer.astype(jnp.bfloat16),
        eps=eps, out_dtype=jnp.bfloat16))
    assert out_bf.dtype == jnp.bfloat16
    assert jnp.allclose(out_bf.astype(jnp.float32), ref, atol=2e-2, rtol=2e-2), \
        float(jnp.max(jnp.abs(out_bf.astype(jnp.float32) - ref)))

    # 4) F=128 exercises the split-store (two unmasked lane-dense slices) path.
    F2 = 128
    bound2 = (6.0 / (D * F2)) ** 0.5
    layer2 = jax.random.uniform(kw, (H, D, F2), jnp.float32, -bound2, bound2)
    out2 = jax.block_until_ready(hedgehog_feature_map(x, layer2, eps=eps))
    ref2 = _reference(x, layer2, 0.0, eps=eps)
    assert out2.shape == (B, H, L, 2 * F2), out2.shape
    assert jnp.allclose(out2, ref2, atol=tol, rtol=tol), \
        float(jnp.max(jnp.abs(out2 - ref2)))

    print("KERNEL_OK")
</pallas_src>

<mosaic_0001>
module attributes {stable_mosaic.version = 11 : i64} {
  func.func @_kernel_nobias(%arg0: i32, %arg1: i32, %arg2: i32, %arg3: memref<1x1x16x32xf32, #tpu.memory_space<vmem>>, %arg4: memref<1x32x64xf32, #tpu.memory_space<vmem>>, %arg5: memref<1x1x16x128xf32, #tpu.memory_space<vmem>>) attributes {dimension_semantics = [#tpu.dimension_semantics<parallel>, #tpu.dimension_semantics<parallel>, #tpu.dimension_semantics<parallel>], iteration_bounds = array<i64: 4, 2, 1>, scalar_prefetch = 0 : i64, scratch_operands = 0 : i64, tpu.core_type = #tpu.core_type<tc>, window_params = [{transform_indices = @transform_0, window_bounds = array<i64: 1, 1, 16, 32>}, {transform_indices = @transform_1, window_bounds = array<i64: 1, 32, 64>}, {transform_indices = @transform_2, window_bounds = array<i64: 1, 1, 16, 128>}]} {
    %c0 = arith.constant 0 : index
    %c0_0 = arith.constant 0 : index
    %c0_1 = arith.constant 0 : index
    %c0_2 = arith.constant 0 : index
    %0 = vector.load %arg3[%c0, %c0_0, %c0_1, %c0_2] : memref<1x1x16x32xf32, #tpu.memory_space<vmem>>, vector<1x1x16x32xf32>
    %1 = vector.shape_cast %0 : vector<1x1x16x32xf32> to vector<16x32xf32>
    %c0_3 = arith.constant 0 : index
    %c0_4 = arith.constant 0 : index
    %c0_5 = arith.constant 0 : index
    %2 = vector.load %arg4[%c0_3, %c0_4, %c0_5] : memref<1x32x64xf32, #tpu.memory_space<vmem>>, vector<1x32x64xf32>
    %3 = vector.shape_cast %2 : vector<1x32x64xf32> to vector<32x64xf32>
    %cst = arith.constant dense<0.000000e+00> : vector<16x64xf32>
    %4 = tpu.matmul %1, %3, %cst {dimension_numbers = #tpu.dot_dimension_numbers<[1], [0], [0], [1], [0, 0, 1, 1], [], []>} : vector<16x32xf32>, vector<32x64xf32>, vector<16x64xf32> -> vector<16x64xf32>
    %cst_6 = arith.constant dense<0xFF800000> : vector<16xf32>
    %5 = vector.multi_reduction <maximumf>, %4, %cst_6 [1] : vector<16x64xf32> to vector<16xf32>
    %6 = vector.shape_cast %5 : vector<16xf32> to vector<16x1xf32>
    %cst_7 = arith.constant dense<0x7F800000> : vector<16xf32>
    %7 = vector.multi_reduction <minimumf>, %4, %cst_7 [1] : vector<16x64xf32> to vector<16xf32>
    %8 = vector.shape_cast %7 : vector<16xf32> to vector<16x1xf32>
    %9 = vector.broadcast %6 : vector<16x1xf32> to vector<16x64xf32>
    %10 = arith.subf %4, %9 : vector<16x64xf32>
    %11 = vector.broadcast %8 : vector<16x1xf32> to vector<16x64xf32>
    %12 = arith.subf %11, %4 : vector<16x64xf32>
    %13 = tpu.concatenate %10, %12 in 1 : vector<16x64xf32>, vector<16x64xf32> -> vector<16x128xf32>
    %14 = math.exp %13 : vector<16x128xf32>
    %15 = tpu.iota {dimensions = array<i32: 1>} : vector<16x128xi32>
    %c64_i32 = arith.constant 64 : i32
    %16 = vector.broadcast %c64_i32 : i32 to vector<16x128xi32>
    %17 = arith.cmpi slt, %15, %16 : vector<16x128xi32>
    %cst_8 = arith.constant 0.000000e+00 : f32
    %18 = vector.broadcast %cst_8 : f32 to vector<16x128xf32>
    %19 = arith.select %17, %14, %18 : vector<16x128xi1>, vector<16x128xf32>
    %cst_9 = arith.constant dense<0.000000e+00> : vector<16xf32>
    %20 = vector.multi_reduction <add>, %19, %cst_9 [1] : vector<16x128xf32> to vector<16xf32>
    %21 = vector.shape_cast %20 : vector<16xf32> to vector<16x1xf32>
    %cst_10 = arith.constant 0.000000e+00 : f32
    %22 = vector.broadcast %cst_10 : f32 to vector<16x128xf32>
    %23 = arith.select %17, %22, %14 : vector<16x128xi1>, vector<16x128xf32>
    %cst_11 = arith.constant dense<0.000000e+00> : vector<16xf32>
    %24 = vector.multi_reduction <add>, %23, %cst_11 [1] : vector<16x128xf32> to vector<16xf32>
    %25 = vector.shape_cast %24 : vector<16xf32> to vector<16x1xf32>
    %26 = tpu.reciprocal %21 {approx = true} : vector<16x1xf32> -> vector<16x1xf32>
    %27 = tpu.reciprocal %25 {approx = true} : vector<16x1xf32> -> vector<16x1xf32>
    %28 = vector.shape_cast %26 : vector<16x1xf32> to vector<16x1xf32>
    %29 = vector.broadcast %28 : vector<16x1xf32> to vector<16x128xf32>
    %30 = vector.shape_cast %27 : vector<16x1xf32> to vector<16x1xf32>
    %31 = vector.broadcast %30 : vector<16x1xf32> to vector<16x128xf32>
    %32 = arith.select %17, %29, %31 : vector<16x128xi1>, vector<16x128xf32>
    %33 = arith.mulf %14, %32 : vector<16x128xf32>
    %cst_12 = arith.constant 9.99999996E-13 : f32
    %34 = vector.broadcast %cst_12 : f32 to vector<16x128xf32>
    %35 = arith.maximumf %33, %34 : vector<16x128xf32>
    %c0_13 = arith.constant 0 : index
    %c0_14 = arith.constant 0 : index
    %c0_15 = arith.constant 0 : index
    %c0_16 = arith.constant 0 : index
    %36 = vector.load %arg5[%c0_13, %c0_14, %c0_15, %c0_16] : memref<1x1x16x128xf32, #tpu.memory_space<vmem>>, vector<1x1x16x128xf32>
    %37 = vector.shape_cast %36 : vector<1x1x16x128xf32> to vector<16x128xf32>
    %38 = vector.shape_cast %35 : vector<16x128xf32> to vector<1x1x16x128xf32>
    tpu.vector_store %arg5[%c0_13, %c0_14, %c0_15, %c0_16], %38 {strides = array<i32>} : memref<1x1x16x128xf32, #tpu.memory_space<vmem>>, vector<1x1x16x128xf32>,
    return
  }
  func.func @transform_0(%arg0: i32, %arg1: i32, %arg2: i32) -> (i32, i32, i32, i32) {
    %c0_i32 = arith.constant 0 : i32
    %c0_i32_0 = arith.constant 0 : i32
    return %arg1, %arg0, %arg2, %c0_i32 : i32, i32, i32, i32
  }
  func.func @transform_1(%arg0: i32, %arg1: i32, %arg2: i32) -> (i32, i32, i32) {
    %c0_i32 = arith.constant 0 : i32
    %c0_i32_0 = arith.constant 0 : i32
    %c0_i32_1 = arith.constant 0 : i32
    return %arg0, %c0_i32, %c0_i32_0 : i32, i32, i32
  }
  func.func @transform_2(%arg0: i32, %arg1: i32, %arg2: i32) -> (i32, i32, i32, i32) {
    %c0_i32 = arith.constant 0 : i32
    %c0_i32_0 = arith.constant 0 : i32
    return %arg1, %arg0, %arg2, %c0_i32 : i32, i32, i32, i32
  }
}

</mosaic_0001>

<bundles_post_ra>
// kernel: tpu_custom_call.1
= control target key start
LH: loop header
LB: loop body
LE: loop exit
PB: predicated region body
PF: predicated region fallthrough
CT: control target
= control target key end

     0   :  { %s1163_s0 = inlined_call_operand.hbm [shape: f32[2,4,16,32], index: 0, kind: input, shape index: {}]   ;;  %s1164_s1 = inlined_call_operand.hbm [shape: f32[4,32,64], index: 1, kind: input, shape index: {}]   ;;  %s1165_s2 = inlined_call_operand.hbm [shape: f32[2,4,16,128], index: 2, kind: output, shape index: {}]  }
   0x1   :  { %1173 = sst [smem:[#allocation15_spill]] %s1165_s2 }
   0x2   :  { %7 = vsyncpa [#allocation3], 0 }
   0x3   :  { %9 = vsyncpa [#allocation3 + $0x1], 0 }
   0x4   :  { %10 = vsyncpa [#allocation6], 0 }
   0x5   :  { %12 = vsyncpa [#allocation6 + $0x1], 0 }
   0x6   :  { %13 = vsyncpa [#allocation4], 0 }
   0x7   :  { %15 = vsyncpa [#allocation4 + $0x1], 0  ;;  %s889_s9 = smov 0   ;;  %s891_s10 = smov 0  }
   0x8   :  { %s893_s11 = smov 0   ;;  %s895_s12 = smov 0  }
   0x9   :  { %s897_s13 = smov 0   ;;  %s899_s14 = smov 0  }
   0xa   :  { %s901_s15 = smov 0   ;;  %s903_s16 = smov 0  }
   0xb   :  { %s905_s17 = smov 0   ;;  %s907_s18 = smov 0  }
   0xc   :  { %s909_s19 = smov 0  }
   0xd LB: > { %1174 = sst [smem:[#allocation11_spill]] %s836_s12  ;;  %s519_s20 = sadd.s32 4294967295, %s864_s19   ;;  %s864_s19 = sphi %s909_s19, %s21_s19   ;;  %s860_s18 = sphi %s907_s18, %s1205_s18   ;;  %s856_s17 = sphi %s905_s17, %s1204_s17   ;;  %s852_s16 = sphi %s903_s16, %s1203_s16   ;;  %s848_s15 = sphi %s901_s15, %s1202_s15   ;;  %s844_s14 = sphi %s899_s14, %s1201_s14   ;;  %s840_s13 = sphi %s897_s13, %s1200_s13   ;;  %s836_s12 = sphi %s895_s12, %s1199_s12   ;;  %s832_s11 = sphi %s893_s11, %s1198_s11   ;;  %s828_s10 = sphi %s891_s10, %s1197_s10   ;;  %s824_s9 = sphi %s889_s9, %s1196_s9  }
   0xe   : > { %s520_s21 = sadd.s32 4294967294, %s864_s19   ;;  %s36_s22 = sadd.s32 1, %s856_s17 }
   0xf   : > { %s40_s23 = sadd.s32 1, %s860_s18  ;;  %p38_p0 = scmp.ge.s32.totalorder %s36_s22, 2 }
  0x10   : > { %s51_s24 = sadd.s32 1, %s844_s14  ;;  %p58_p1 = scmp.ne.s32.totalorder %s844_s14, %s840_s13 }
  0x11   : > { %p1171_p2 = scmp.eq.s32.totalorder %s864_s19, 0  ;;  %s1207_s22 = smov (%p38_p0, %s36_s22), 0 }
  0x12   : > { %1175 = sst [smem:[#allocation12_spill]] %s1207_s22  ;;  %s1209_s23 = smov (!%p38_p0, %s40_s23), %s860_s18 }
  0x13   : > { %s44_s25 = ssub.s32 %s856_s17, %s1207_s22  ;;  %p959_p3 = por %p1171_p2, %p58_p1 }
  0x14   : > { %p42_p4 = scmp.ge.s32.totalorder %s1209_s23, 4  ;;  %p64_p5 = scmp.ne.s32.totalorder %s840_s13, %s836_s12 }
  0x15   : > { %p965_p6 = scmp.eq.s32.totalorder %s519_s20, 0  ;;  %p118_p7 = scmp.eq.s32.totalorder %s519_s20, 7 }
  0x16   : > { %s1211_s23 = smov (%p42_p4, %s1209_s23), 0  ;;  %p124_p10 = scmp.eq.s32.totalorder %s520_s21, 7 }
  0x17   : > { %1178 = sst [smem:[#allocation13_spill]] %s1211_s23  ;;  %p973_p8 = por %p965_p6, %p64_p5 }
  0x18   : > { %p977_p9 = por %p118_p7, %p58_p1  ;;  %s983_s30 = ssub.s32 %s860_s18, %s1211_s23 }
  0x19   : > { %s46_s3 = sor.u32 %s983_s30, %s44_s25  ;;  %p987_p13 = por %p124_p10, %p64_p5 }
  0x1a   : > { %p49_p12 = scmp.eq.s32.totalorder %s46_s3, 0  ;;  %p577_p0 = scmp.lt.s32.totalorder %s864_s19, 8 }
  0x1b   : > { %s1181_s4 = scalar_select %p987_p13, 1, 0 }
  0x1c   : > { %s993_s5 = scalar_select %p49_p12, %s844_s14, %s51_s24  }
  0x1d   : > { %1182 = sst [smem:[#allocation14_spill]] %s1181_s4  ;;  %s144_s6 = sand.u32 1, %s844_s14  }
  0x1e   : > { %s524_s7 = sshll.u32 %s860_s18, 1  ;;  %s523_s8 = sshll.u32 %s144_s6, 4 }
  0x1f   : > { %s525_s20 = sshll.u32 %s856_s17, 3  ;;  %s148_s22 = scalar_lea.vmem [#allocation2], %s523_s8 }
  0x20   : > { %s156_s23 = sadd.s32 %s525_s20, %s524_s7  ;;  %s159_s21 = sshll.u32 %s148_s22, 4  ;;  %s160_s21 = int_to_ptr.vmem [resolvable:$true] %s159_s21 }
  0x21   : > { %s526_s25 = sshll.u32 %s156_s23, 7  ;;  %p1005_p1 = pnand %p577_p0, %p959_p3 }
  0x22   : > { %s158_s3 = scalar_lea.hbm %s1163_s0, %s526_s25  ;;  %p530_p4 = scmp.ge.s32.totalorder %s864_s19, 1 }
  0x23   : > { %s145_s24 = scalar_lea.sflag [#allocation3], %s144_s6  ;;  %p686_p5 = pneg %p1005_p1 }
  0x24   : > { %s697_s7 = scalar_lea.vmem %s160_s21, 256  ;;  %s866_s22 = smov [#allocation2]  }
  0x25   : > { %p698_p7 = scmp.ne.s32.totalorder %s160_s21, %s697_s7  ;;  %s702_s23 = sshll.u32 %s866_s22, 4  ;;  %s703_s23 = int_to_ptr.vmem [resolvable:$false] %s702_s23 }
  0x26   : > { %s704_s2 = scalar_lea.vmem %s703_s23, 512  ;;  %p705_p2 = scmp.lt.s32.totalorder %s160_s21, %s703_s23 }
  0x27   : > { %p700_p10 = pnand %p698_p7, %p686_p5  ;;  %p706_p11 = scmp.lt.s32.totalorder %s704_s2, %s697_s7 }
  0x29   : > { %p701_p12 = pneg %p700_p10  ;;  %p707_p13 = por %p706_p11, %p705_p2 }
  0x2b   : > { %p708_p3 = pnand %p707_p13, %p701_p12 }
  0x2d   : > { %711 = shalt.err (!%p708_p3)
}
  0x2e   : > { %s1172_s12 = smov 128   ;;  %s868_s26 = smov 8  }
  0x2f   : > { %569 = dma.hbm_to_vmem [thread:$0]  (!%p1005_p1), %s158_s3, 256, %s160_s21, %s145_s24, %s1172_s12, %s1172_s12, %s868_s26  }
  0x30   : > { %p188_p2 = scmp.lt.s32.totalorder %s864_s19, 9  ;;  %s77_s8 = sadd.s32 1, %s832_s11 }
  0x31   : > { %p84_p13 = scmp.ne.s32.totalorder %s832_s11, %s828_s10  ;;  %p1185_p5 = scmp.eq.s32.totalorder %s983_s30, 0 }
  0x32   : > { %p1020_p11 = pnand %p530_p4, %p188_p2  ;;  %p1186_p7 = scmp.eq.s32.totalorder %s864_s19, 0 }
  0x33   : > { %s1030_s20 = scalar_select %p1185_p5, %s832_s11, %s77_s8  }
  0x34   : > { %p86_p10 = por %p84_p13, %p1186_p7  ;;  %p90_p12 = scmp.ne.s32.totalorder %s828_s10, %s824_s9 }
  0x35   : > { %s169_s25 = sand.u32 1, %s832_s11   ;;  %s542_s4 = sshll.u32 %s860_s18, 9 }
  0x36   : > { %p1040_p3 = por %p90_p12, %p965_p6  ;;  %s527_s21 = sshll.u32 %s169_s25, 5 }
  0x37   : > { %s179_s22 = scalar_lea.hbm %s1164_s1, %s542_s4  ;;  %p1049_p1 = pnand %p577_p0, %p86_p10 }
  0x38   : > { %s173_s23 = scalar_lea.vmem [#allocation5], %s527_s21  ;;  %s170_s2 = scalar_lea.sflag [#allocation6], %s169_s25 }
  0x39   : > { %s180_s9 = sshll.u32 %s173_s23, 4  ;;  %p714_p6 = pneg %p1049_p1  ;;  %s181_s9 = int_to_ptr.vmem [resolvable:$true] %s180_s9 }
  0x3a   : > { %s725_s27 = scalar_lea.vmem %s181_s9, 512  ;;  %s869_s8 = smov [#allocation5]  }
  0x3b   : > { %p726_p4 = scmp.ne.s32.totalorder %s181_s9, %s725_s27  ;;  %s730_s12 = sshll.u32 %s869_s8, 4  ;;  %s731_s12 = int_to_ptr.vmem [resolvable:$false] %s730_s12 }
  0x3c   : > { %s732_s4 = scalar_lea.vmem %s731_s12, 1024  ;;  %p733_p5 = scmp.lt.s32.totalorder %s181_s9, %s731_s12 }
  0x3d   : > { %p728_p2 = pnand %p726_p4, %p714_p6  ;;  %p734_p0 = scmp.lt.s32.totalorder %s732_s4, %s725_s27 }
  0x3f   : > { %p729_p13 = pneg %p728_p2  ;;  %p735_p7 = por %p734_p0, %p733_p5 }
  0x41   : > { %p736_p10 = pnand %p735_p7, %p729_p13 }
  0x43   : > { %739 = shalt.err (!%p736_p10)
}
  0x44   : > { %s1189_s21 = smov 128   ;;  %192 = sbr.rel (%p1020_p11) target bundleno = 735 (0x2df), region = 28 }
  0x45   : > { %572 = dma.hbm_to_vmem [thread:$0]  (!%p1049_p1), %s179_s22, 512, %s181_s9, %s170_s2, %s1189_s21, %s1189_s21, %s868_s26  }
  0x46   : > { %s1063_s25 = sand.u32 (!%p1020_p11), 1, %s840_s13  }
  0x47   : > { %s531_s12 = sshll.u32 (!%p1020_p11), %s1063_s25, 4  ;;  %s195_s3 = scalar_lea.sflag (!%p1020_p11), [#allocation3], %s1063_s25 }
  0x48   : > { %s198_s24 = scalar_lea.vmem (!%p1020_p11), [#allocation2], %s531_s12 }
  0x49   : > { %811 = dma.done.wait (%p973_p8), %s195_s3, 256  }
  0x4a   : > { %813 = vsyncadd (%p973_p8), %s195_s3, 4294967040  ;;  %s203_s26 = sand.u32 1, %s828_s10  }
  0x4b   : > { %s532_s6 = sshll.u32 %s203_s26, 5  ;;  %s204_s22 = scalar_lea.sflag [#allocation6], %s203_s26 }
  0x4c   : > { %s207_s30 = scalar_lea.vmem [#allocation5], %s532_s6 }
  0x4d   : > { %815 = dma.done.wait (%p1040_p3), %s204_s22, 512  }
  0x4e   : > { %817 = vsyncadd (%p1040_p3), %s204_s22, 4294966784  ;;  %vm241_vm0 = vcmask 261120   ;;  %v240_v0 = vld [vmem:[%s207_s30 + $0x18] sm:$0xff]  ;;  %v239_v1 = vld [vmem:[%s207_s30 + $0x10] sm:$0xff]  ;;  %vm323_vm1 = vcmask 523264   ;;  %s870_s28 = smov 64   ;;  %v354_v26 = vlaneseq }
  0x4f   : > { %549 = vmatprep.subr.mxu0 %v240_v0  ;;  %v235_v2 = vld [vmem:[%s198_s24] sm:$0xff]  ;;  %v238_v3 = vld [vmem:[%s207_s30 + $0x8] sm:$0xff]  ;;  %s537_s7 = sshll.u32 %s852_s16, 1  ;;  %s538_s23 = sshll.u32 %s848_s15, 3 }
  0x50   : > { %550 = vmatpush3.msra.mxu0 %v240_v0  ;;  %557 = vmatprep.mubr.msk.f32.mxu0 %vm241_vm0, %v235_v2  ;;  %v237_v4 = vld [vmem:[%s207_s30] sm:$0xff]  ;;  %v236_v5 = vld [vmem:[%s198_s24 + $0x8] sm:$0xff]  ;;  %v355_v27 = vand.u32 127, %v354_v26  ;;  %s396_s9 = sadd.s32 %s538_s23, %s537_s7  ;;  %s232_s27 = scalar_lea.vmem [#allocation7], %s531_s12 }
  0x51   : > { %551 = vmatprep.subr.mxu0 %v239_v1  ;;  %s539_s2 = sshll.u32 %s396_s9, 7  ;;  %s399_s8 = sshll.u32 %s232_s27, 4  ;;  %s1101_s8 = int_to_ptr.vmem [resolvable:$true] %s399_s8 }
  0x52   : > { %552 = vmatpush3.msra.mxu0 %v239_v1  ;;  %vm356_vm2 = vcmp.lt.s32.totalorder %v355_v27, 64  ;;  %s1190_s4 = sld [smem:[#allocation15_spill]]  ;;  %s382_s3 = scalar_lea.sflag [#allocation4], %s1063_s25 }
  0x53   : > { %553 = vmatprep.subr.mxu0 %v238_v3  ;;  %s740_s12 = scalar_lea.vmem %s1101_s8, 256  ;;  %s871_s24 = smov [#allocation7]  }
  0x54   : > { %554 = vmatpush3.msra.mxu0 %v238_v3  ;;  %p741_p8 = scmp.ne.s32.totalorder %s1101_s8, %s740_s12  ;;  %s744_s26 = sshll.u32 %s871_s24, 4  ;;  %s745_s26 = int_to_ptr.vmem [resolvable:$false] %s744_s26 }
  0x55   : > { %555 = vmatprep.subr.mxu0 %v237_v4  ;;  %s746_s6 = scalar_lea.vmem %s745_s26, 512  ;;  %p747_p3 = scmp.lt.s32.totalorder %s1101_s8, %s745_s26 }
  0x56   : > { %556 = vmatpush3.msra.mxu0 %v237_v4  ;;  %p742_p11 = pnand %p741_p8, %p977_p9  ;;  %p748_p1 = scmp.lt.s32.totalorder %s746_s6, %s740_s12 }
  0x57   : > { %558 = vmatmul.mubr.msk.f32.vlgmr.msra.gmra.mxu0 %vm241_vm0, %v236_v5 }
  0x58   : > { %s1099_s21 = scalar_lea.hbm %s1190_s4, %s539_s2  ;;  %p743_p12 = pneg %p742_p11 }
  0x59   : > { %p749_p6 = por %p748_p1, %p747_p3 }
  0x5b   : > { %p750_p4 = pnand %p749_p6, %p743_p12 }
 0x117   : > { %v559_v6 = vpop.f32.mrf.mxu0 }
 0x118   : > { %v327_v7 = vsel %vm323_vm1, %v559_v6, -inf  ;;  %v333_v11 = vsel %vm323_vm1, %v559_v6, inf }
 0x119   : > { %328 = vmax.xlane.f32.xlu1 %v327_v7  ;;  %v314_v8 = vpop.f32.mrf.mxu0 }
 0x11a   : > { %v330_v9 = vsel %vm323_vm1, %v314_v8, inf  ;;  %v324_v10 = vsel %vm323_vm1, %v314_v8, -inf }
 0x11b   : > { %331 = vmin.xlane.f32.xlu0 %v330_v9 }
 0x11d   : > { %325 = vmax.xlane.f32.xlu1 %v324_v10 }
 0x11f   : > { %334 = vmin.xlane.f32.xlu0 %v333_v11 }
 0x1a2   : > { %v329_v16 = vpop.xlane.xlu1 %328 }
 0x1a3   : > { %v337_v22 = vsub.f32 %v559_v6, %v329_v16 }
 0x1a4   : > { %v332_v12 = vpop.xlane.xlu0 %331 }
 0x1a5   : > { %v338_v13 = vsub.f32 %v332_v12, %v314_v8 }
 0x1a6   : > { %v326_v17 = vpop.xlane.xlu1 %325 }
 0x1a7   : > { %342 = vrot.lane.b32.xlu0 %v338_v13, %s870_s28  ;;  %v336_v18 = vsub.f32 %v314_v8, %v326_v17 }
 0x1a8   : > { %v335_v14 = vpop.xlane.xlu0 %334 }
 0x1a9   : > { %v339_v15 = vsub.f32 %v335_v14, %v559_v6 }
 0x1ab   : > { %344 = vrot.lane.b32.xlu1 %v339_v15, %s870_s28 }
 0x219   : > { %v343_v19 = vpop.permute.xlu0 %342 }
 0x21a   : > { %v348_v20 = vsel %vm323_vm1, %v336_v18, %v343_v19 }
 0x21b   : > { %v350_v21 = vmul.f32 1.442695, %v348_v20 }
 0x21d   : > { %672 = vpow2.f32 %v350_v21  ;;  %v345_v23 = vpop.permute.xlu1 %344 }
 0x21e   : > { %v349_v24 = vsel %vm323_vm1, %v337_v22, %v345_v23 }
 0x21f   : > { %v352_v25 = vmul.f32 1.442695, %v349_v24 }
 0x221   : > { %674 = vpow2.f32 %v352_v25 }
 0x22a   : > { %v673_v28 = vpop.eup %672 }
 0x22b   : > { %v357_v29 = vsel %vm356_vm2, %v673_v28, 0.0  ;;  %v363_v33 = vsel %vm356_vm2, 0.0, %v673_v28 }
 0x22c   : > { %359 = vadd.xlane.f32.xlu1 %v357_v29 }
 0x22e   : > { %v675_v30 = vpop.eup %674 }
 0x22f   : > { %v364_v31 = vsel %vm356_vm2, 0.0, %v675_v30  ;;  %v358_v32 = vsel %vm356_vm2, %v675_v30, 0.0 }
 0x230   : > { %367 = vadd.xlane.f32.xlu1 %v364_v31  ;;  %361 = vadd.xlane.f32.xlu0 %v358_v32 }
 0x234   : > { %365 = vadd.xlane.f32.xlu0 %v363_v33 }
 0x2b5   : > { %v360_v34 = vpop.xlane.xlu1 %359 }
 0x2b9   : > { %v362_v35 = vpop.xlane.xlu0 %361  ;;  %v368_v36 = vpop.xlane.xlu1 %367 }
 0x2ba   : > { %676 = vrcp.f32 %v362_v35 }
 0x2bb   : > { %678 = vrcp.f32 %v368_v36 }
 0x2bc   : > { %680 = vrcp.f32 %v360_v34 }
 0x2bd   : > { %v366_v37 = vpop.xlane.xlu0 %365 }
 0x2be   : > { %682 = vrcp.f32 %v366_v37 }
 0x2c7   : > { %v677_v38 = vpop.eup %676 }
 0x2c8   : > { %v679_v39 = vpop.eup %678 }
 0x2c9   : > { %v374_v40 = vsel %vm356_vm2, %v677_v38, %v679_v39  ;;  %v681_v41 = vpop.eup %680 }
 0x2ca   : > { %v376_v42 = vmul.f32 %v675_v30, %v374_v40 }
 0x2cb   : > { %v683_v43 = vpop.eup %682 }
 0x2cc   : > { %v373_v44 = vsel %vm356_vm2, %v681_v41, %v683_v43  ;;  %v378_v45 = vmax.f32 %v376_v42, 1e-12 }
 0x2cd   : > { %v375_v46 = vmul.f32 %v673_v28, %v373_v44 }
 0x2ce   : > { %380 = vst [vmem:[%s232_s27 + $0x8] sm:$0xff] %v378_v45 }
 0x2cf   : > { %v377_v47 = vmax.f32 %v375_v46, 1e-12 }
 0x2d1   : > { %379 = vst [vmem:[%s232_s27] sm:$0xff] %v377_v47 }
 0x2d2   : > { %753 = shalt.err (!%p750_p4)
}
 0x2d3   : > { %s754_s22 = scalar_lea.hbm %s1099_s21, 256  ;;  %s758_s7 = scalar_lea.hbm %s1190_s4, 2048 }
 0x2d4   : > { %p755_p2 = scmp.ne.s32.totalorder %s1099_s21, %s754_s22  ;;  %p759_p0 = scmp.lt.s32.totalorder %s1099_s21, %s1190_s4 }
 0x2d5   : > { %p760_p7 = scmp.lt.s32.totalorder %s758_s7, %s754_s22 }
 0x2d6   : > { %p756_p13 = pnand %p755_p2, %p977_p9 }
 0x2d7   : > { %p761_p10 = por %p760_p7, %p759_p0 }
 0x2d8   : > { %p757_p5 = pneg %p756_p13 }
 0x2da   : > { %p762_p8 = pnand %p761_p10, %p757_p5 }
 0x2dc   : > { %765 = shalt.err (!%p762_p8)
}
 0x2dd   : > { %s872_s2 = smov 128   ;;  %s873_s27 = smov 8  }
 0x2de   : > { %564 = dma.vmem_to_hbm [thread:$0]  (%p977_p9), %s1101_s8, 256, %s1099_s21, %s382_s3, %s872_s2, %s872_s2, %s873_s27  }
 0x2df PF: > { %s1191_s15 = sld [smem:[#allocation11_spill]]  ;;  %p578_p11 = scmp.ge.s32.totalorder %s864_s19, 2 }
 0x2e0   : > { %s1192_s16 = sld [smem:[#allocation14_spill]] }
 0x2e5   : > { %s414_s12 = sand.u32 1, %s1191_s15  }
 0x2e6   : > { %p1193_p12 = scmp.ne.s32.totalorder %s1192_s16, 0  ;;  %s415_s24 = scalar_lea.sflag [#allocation4], %s414_s12 }
 0x2e8   : > { %p574_p3 = pnand %p578_p11, %p1193_p12 }
 0x2ea   : > { %p575_p1 = pneg %p574_p3 }
 0x2ec   : > { %819 = dma.done.wait (%p575_p1), %s415_s24, 256  }
 0x2ed   : > { %821 = vsyncadd (%p575_p1), %s415_s24, 4294967040  ;;  %s21_s19 = sadd.s32 1, %s864_s19   ;;  %s1194_s29 = sld [smem:[#allocation12_spill]] }
 0x2ee   : > { %p18_p6 = scmp.ge.s32.totalorder %s21_s19, 10   ;;  %s1195_s25 = sld [smem:[#allocation13_spill]] }
 0x2ef   : > { %s1196_s9 = smov %s828_s10  ;;  %s1197_s10 = smov %s832_s11 }
 0x2f0   : > { %s1198_s11 = smov %s1030_s20  ;;  %s1199_s12 = smov %s840_s13 }
 0x2f1   : > { %s1200_s13 = smov %s844_s14  ;;  %s1201_s14 = smov %s993_s5 }
 0x2f2   : > { %s1202_s15 = smov %s856_s17  ;;  %s1203_s16 = smov %s860_s18 }
 0x2f3   : > { %s1204_s17 = smov %s1194_s29  ;;  %20 = sbr.rel (!%p18_p6) target bundleno = 13 (0xd), region = 86 }
 0x2f4   : > { %s1205_s18 = smov %s1195_s25 }
 0x2f8   :  { %420 = vsyncpa [#allocation3], 1 }
 0x2f9   :  { %422 = vsyncpa [#allocation3 + $0x1], 1 }
 0x2fa   :  { %423 = vsyncpa [#allocation6], 1 }
 0x2fb   :  { %425 = vsyncpa [#allocation6 + $0x1], 1 }
 0x2fc   :  { %426 = vsyncpa [#allocation4], 1 }
 0x2fd   :  { %428 = vsyncpa [#allocation4 + $0x1], 1 }

</bundles_post_ra>
